<compile_context>
chip_gen: v6e
topology: v6e:2x2x1
jax: 0.10.0
libtpu: 0.0.40
codegen_flags: <defaults>
</compile_context>

<pallas_src>
import jax
import jax.numpy as jnp
from jax.experimental import pallas as pl
from jax.experimental.pallas import tpu as pltpu

BN_EPS = 1e-5


def _round_up(n, m):
    return ((n + m - 1) // m) * m


def _pad2(a, rows, cols):
    r, c = a.shape
    return jnp.pad(a, ((0, rows - r), (0, cols - c)))


def predictor_encoder(x, w1, gamma, beta, w2, b2, *,
                      tile_v=512, use_bf16_matmul=True, core_splits=1):
    """Fused fc1 -> BatchNorm1d(TRAIN mode) -> ReLU -> fc2.

    x: [B, latent_dim] -> [B, variable_dim].

    Semantics note: this implements *train-mode* BatchNorm1d (per-batch,
    biased-variance statistics), exactly like the PyTorch module in training.
    The fc1 bias is dropped because the batch-mean subtraction cancels it; do
    NOT reuse this kernel for eval-mode (running-stats) BatchNorm.

    core_splits: size of a leading "parallel" grid axis.  Set to 2 on v7x to
    use both TensorCores (fc1+BN+ReLU is recomputed once per core, which is
    cheap relative to streaming w2).
    """
    B, L = x.shape
    H = w1.shape[1]
    V = w2.shape[1]

    mm_dtype = jnp.bfloat16 if use_bf16_matmul else jnp.float32
    elt = 2 if use_bf16_matmul else 4

    # Row padding: bf16 packs 16 rows per vreg; f32 packs 8.
    Bp = _round_up(B, 16 if use_bf16_matmul else 8)
    Lp = _round_up(L, 128)
    Hp = _round_up(H, 128)

    # Lane-dense V tiling: round tile_v to a multiple of 128 and pad V up to a
    # whole number of tiles (user-supplied tile_v is honored, never dropped).
    tv = _round_up(max(int(tile_v), 128), 128)
    Vp = _round_up(V, tv)
    nv_total = Vp // tv
    cs = max(1, int(core_splits))
    while nv_total % cs != 0:       # keep the 2-D grid rectangular
        cs -= 1
    nv_per = nv_total // cs

    xp = _pad2(x.astype(jnp.float32), Bp, Lp).astype(mm_dtype)
    w1p = _pad2(w1.astype(jnp.float32), Lp, Hp).astype(mm_dtype)
    w2p = _pad2(w2.astype(jnp.float32), Hp, Vp).astype(mm_dtype)
    gp = _pad2(gamma.reshape(1, H).astype(jnp.float32), 1, Hp)
    btp = _pad2(beta.reshape(1, H).astype(jnp.float32), 1, Hp)
    b2p = _pad2(b2.reshape(1, V).astype(jnp.float32), 1, Vp)

    inv_b = 1.0 / float(B)  # true batch size; zero-padded rows add 0 to the sums

    def kernel(x_ref, w1_ref, g_ref, bta_ref, w2_ref, b2_ref, o_ref, h_ref):
        # fc1 + BatchNorm(train) + ReLU: computed once per core (first V step
        # that core sees); result persists in VMEM scratch across the
        # sequential ("arbitrary") inner V steps.
        @pl.when(pl.program_id(1) == 0)
        def _():
            h = jnp.dot(x_ref[...], w1_ref[...],
                        preferred_element_type=jnp.float32)
            # Batch statistics via thin ones-matmuls (rides the MXU slot)
            # instead of axis-0 XLU reductions.  Biased variance (PyTorch
            # train-mode).  Single-pass; max() guards tiny negative values
            # from cancellation.
            ones = jnp.ones((1, Bp), jnp.float32)
            s1 = jnp.dot(ones, h, preferred_element_type=jnp.float32)
            s2 = jnp.dot(ones, h * h, preferred_element_type=jnp.float32)
            mean = s1 * inv_b
            var = jnp.maximum(s2 * inv_b - mean * mean, 0.0)
            scale = g_ref[...] * jax.lax.rsqrt(var + BN_EPS)
            shift = bta_ref[...] - mean * scale
            h_ref[...] = jnp.maximum(h * scale + shift, 0.0).astype(h_ref.dtype)

        # fc2 tile: [Bp, Hp] @ [Hp, tv] + [1, tv]
        o_ref[...] = (jnp.dot(h_ref[...], w2_ref[...],
                              preferred_element_type=jnp.float32)
                      + b2_ref[...]).astype(o_ref.dtype)

    # ---- VMEM budget from the actual buffer math ----------------------------
    def _tile_bytes(rows, cols, e):
        return _round_up(max(rows, 1), 8) * _round_up(max(cols, 1), 128) * e

    stream_buf = min(3, max(2, nv_per))   # pipeline depth for w2 / b2 / out
    fixed_bytes = (_tile_bytes(Bp, Lp, elt)        # x      (single-buffered)
                   + _tile_bytes(Lp, Hp, elt)      # w1     (single-buffered)
                   + 2 * _tile_bytes(1, Hp, 4)     # gamma, beta
                   + _tile_bytes(Bp, Hp, elt))     # persistent h scratch
    per_tile_bytes = (_tile_bytes(Hp, tv, elt)     # w2 tile
                      + _tile_bytes(1, tv, 4)      # b2 tile
                      + _tile_bytes(Bp, tv, 4))    # out tile
    need = fixed_bytes + (stream_buf + 1) * per_tile_bytes
    try:
        vmem_cap = int(pltpu.get_tpu_info().vmem_capacity_bytes)
    except Exception:
        vmem_cap = 64 * 1024 * 1024                # conservative: v7x per-core
    vmem_limit = min(max(need + (8 << 20), 32 << 20), (vmem_cap * 3) // 4)
    # TODO(synk): if Lp*Hp (w1) + Bp*Hp (h) no longer fit this budget (large H
    # in f32 on v7x), add an H-chunk grid axis with an f32 fc2 accumulator.
    # TODO(synk): int8-quantized w2 (per-column dequant folded into b2) for
    # v5e/v6e, fp8 on v7x, for another ~2x cut in streamed w2 bytes.

    out_shape = jax.ShapeDtypeStruct((Bp, Vp), jnp.float32)
    compiler_params = pltpu.CompilerParams(
        # Leading axis "parallel" lets v7x shard the fc2 stream across both
        # TensorCores; the inner V axis must stay sequential on one core so
        # the h scratch persists across its steps.
        dimension_semantics=("parallel", "arbitrary"),
        vmem_limit_bytes=int(vmem_limit),
    )

    def _index_fixed(c, j):
        return (0, 0)

    def _index_vtile(c, j):
        return (0, c * nv_per + j)

    def _run(with_buffer_hints):
        def spec(shape, index_map, buffers):
            if with_buffer_hints:
                return pl.BlockSpec(shape, index_map,
                                    pipeline_mode=pl.Buffered(buffers))
            return pl.BlockSpec(shape, index_map)

        grid_spec = pltpu.PrefetchScalarGridSpec(
            num_scalar_prefetch=0,
            grid=(cs, nv_per),
            in_specs=[
                spec((Bp, Lp), _index_fixed, 1),            # x     (invariant)
                spec((Lp, Hp), _index_fixed, 1),            # w1    (invariant)
                spec((1, Hp), _index_fixed, 1),             # gamma (invariant)
                spec((1, Hp), _index_fixed, 1),             # beta  (invariant)
                spec((Hp, tv), _index_vtile, stream_buf),   # w2 tile
                spec((1, tv), _index_vtile, stream_buf),    # b2 tile
            ],
            out_specs=spec((Bp, tv), _index_vtile, stream_buf),
            scratch_shapes=[pltpu.VMEM((Bp, Hp), mm_dtype)],  # persistent h
        )
        return pl.pallas_call(
            kernel,
            out_shape=out_shape,
            grid_spec=grid_spec,
            compiler_params=compiler_params,
        )(xp, w1p, gp, btp, w2p, b2p)

    try:
        out_padded = _run(True)
    except Exception:
        # pl.Buffered pipeline hints not supported by this jax build/config;
        # fall back to the default double-buffered pipeline.
        out_padded = _run(False)

    return out_padded[:B, :V]


def init_params(key, latent_dim, variable_dim):
    hidden = latent_dim // 2
    k1, k2, k3, k4 = jax.random.split(key, 4)
    bound1 = 1.0 / jnp.sqrt(latent_dim)
    w1 = jax.random.uniform(k1, (latent_dim, hidden), jnp.float32, -bound1, bound1)
    b1 = jax.random.uniform(k2, (hidden,), jnp.float32, -bound1, bound1)
    gamma = jnp.ones((hidden,), jnp.float32)   # BatchNorm1d default weight
    beta = jnp.zeros((hidden,), jnp.float32)   # BatchNorm1d default bias
    bound2 = 1.0 / jnp.sqrt(hidden)
    w2 = jax.random.uniform(k3, (hidden, variable_dim), jnp.float32, -bound2, bound2)
    b2 = jax.random.uniform(k4, (variable_dim,), jnp.float32, -bound2, bound2)
    return w1, b1, gamma, beta, w2, b2


def reference(x, w1, b1, gamma, beta, w2, b2):
    # Faithful PyTorch train-mode semantics, including the fc1 bias (which the
    # train-mode BN mean-subtraction cancels — the kernel exploits that).
    h = x @ w1 + b1[None, :]
    mean = jnp.mean(h, axis=0, keepdims=True)
    var = jnp.mean((h - mean) ** 2, axis=0, keepdims=True)
    h = (h - mean) / jnp.sqrt(var + BN_EPS) * gamma[None, :] + beta[None, :]
    h = jnp.maximum(h, 0.0)
    return h @ w2 + b2[None, :]


if __name__ == "__main__":
    key = jax.random.PRNGKey(0)

    # ---- Config 1: small module sizes (latent=32 -> hidden=16, V=16) --------
    latent_dim, variable_dim, batch = 32, 16, 8
    kx, kp, key = jax.random.split(key, 3)
    x = jax.random.normal(kx, (batch, latent_dim), jnp.float32)
    w1, b1, gamma, beta, w2, b2 = init_params(kp, latent_dim, variable_dim)
    ref = reference(x, w1, b1, gamma, beta, w2, b2)

    # Default path: bf16 matmuls, f32 accumulation + f32 BN statistics.
    out = predictor_encoder(x, w1, gamma, beta, w2, b2)
    out = jax.block_until_ready(out)
    assert out.shape == (batch, variable_dim)
    assert jnp.allclose(out, ref, atol=1e-1, rtol=1e-1), \
        float(jnp.max(jnp.abs(out - ref)))

    # f32 path (tight check).
    out_f32 = predictor_encoder(x, w1, gamma, beta, w2, b2,
                                use_bf16_matmul=False)
    out_f32 = jax.block_until_ready(out_f32)
    assert out_f32.shape == (batch, variable_dim)
    assert jnp.allclose(out_f32, ref, atol=1e-3, rtol=1e-3), \
        float(jnp.max(jnp.abs(out_f32 - ref)))

    # ---- Config 2: multi-tile V grid (streams w2 tiles) + core split --------
    latent_dim, variable_dim, batch = 64, 512, 12
    kx, kp = jax.random.split(key)
    x = jax.random.normal(kx, (batch, latent_dim), jnp.float32)
    w1, b1, gamma, beta, w2, b2 = init_params(kp, latent_dim, variable_dim)
    ref = reference(x, w1, b1, gamma, beta, w2, b2)

    # 4 V-tiles on one core: exercises the 3-deep streaming pipeline.
    out_stream = predictor_encoder(x, w1, gamma, beta, w2, b2, tile_v=128)
    out_stream = jax.block_until_ready(out_stream)
    assert out_stream.shape == (batch, variable_dim)
    assert jnp.allclose(out_stream, ref, atol=1e-1, rtol=1e-1), \
        float(jnp.max(jnp.abs(out_stream - ref)))

    # Dual-core layout (v7x): leading "parallel" axis of 2, fc1 per core.
    out_split = predictor_encoder(x, w1, gamma, beta, w2, b2,
                                  tile_v=128, core_splits=2)
    out_split = jax.block_until_ready(out_split)
    assert jnp.allclose(out_split, ref, atol=1e-1, rtol=1e-1), \
        float(jnp.max(jnp.abs(out_split - ref)))

    print("KERNEL_OK")
</pallas_src>

<mosaic_0001>
module attributes {stable_mosaic.version = 11 : i64} {
  func.func @kernel(%arg0: i32, %arg1: i32, %arg2: memref<16x128xbf16, #tpu.memory_space<vmem>>, %arg3: memref<128x128xbf16, #tpu.memory_space<vmem>>, %arg4: memref<1x128xf32, #tpu.memory_space<vmem>>, %arg5: memref<1x128xf32, #tpu.memory_space<vmem>>, %arg6: memref<128x512xbf16, #tpu.memory_space<vmem>>, %arg7: memref<1x512xf32, #tpu.memory_space<vmem>>, %arg8: memref<16x512xf32, #tpu.memory_space<vmem>>, %arg9: memref<16x128xbf16, #tpu.memory_space<vmem>>) attributes {dimension_semantics = [#tpu.dimension_semantics<parallel>, #tpu.dimension_semantics<arbitrary>], iteration_bounds = array<i64: 1, 1>, scalar_prefetch = 0 : i64, scratch_operands = 1 : i64, tpu.core_type = #tpu.core_type<tc>, window_params = [{pipeline_mode = #tpu.pipeline_mode<synchronous>, transform_indices = @transform_0, window_bounds = array<i64: 16, 128>}, {pipeline_mode = #tpu.pipeline_mode<synchronous>, transform_indices = @transform_1, window_bounds = array<i64: 128, 128>}, {pipeline_mode = #tpu.pipeline_mode<synchronous>, transform_indices = @transform_2, window_bounds = array<i64: 1, 128>}, {pipeline_mode = #tpu.pipeline_mode<synchronous>, transform_indices = @transform_3, window_bounds = array<i64: 1, 128>}, {pipeline_mode = #tpu.pipeline_mode<double_buffered>, transform_indices = @transform_4, window_bounds = array<i64: 128, 512>}, {pipeline_mode = #tpu.pipeline_mode<double_buffered>, transform_indices = @transform_5, window_bounds = array<i64: 1, 512>}, {pipeline_mode = #tpu.pipeline_mode<double_buffered>, transform_indices = @transform_6, window_bounds = array<i64: 16, 512>}]} {
    %c0_i32 = arith.constant 0 : i32
    %0 = arith.cmpi eq, %arg1, %c0_i32 : i32
    %1 = arith.extui %0 : i1 to i32
    %c0_i32_0 = arith.constant 0 : i32
    %2 = arith.cmpi ne, %1, %c0_i32_0 : i32
    scf.if %2 {
      %c0_8 = arith.constant 0 : index
      %c0_9 = arith.constant 0 : index
      %10 = vector.load %arg2[%c0_8, %c0_9] : memref<16x128xbf16, #tpu.memory_space<vmem>>, vector<16x128xbf16>
      %c0_10 = arith.constant 0 : index
      %c0_11 = arith.constant 0 : index
      %11 = vector.load %arg3[%c0_10, %c0_11] : memref<128x128xbf16, #tpu.memory_space<vmem>>, vector<128x128xbf16>
      %cst_12 = arith.constant dense<0.000000e+00> : vector<16x128xf32>
      %12 = tpu.matmul %10, %11, %cst_12 {dimension_numbers = #tpu.dot_dimension_numbers<[1], [0], [0], [1], [0, 0, 1, 1], [], []>} : vector<16x128xbf16>, vector<128x128xbf16>, vector<16x128xf32> -> vector<16x128xf32>
      %cst_13 = arith.constant 1.000000e+00 : f32
      %13 = vector.broadcast %cst_13 : f32 to vector<1x16xf32>
      %cst_14 = arith.constant dense<0.000000e+00> : vector<1x128xf32>
      %14 = tpu.matmul %13, %12, %cst_14 {dimension_numbers = #tpu.dot_dimension_numbers<[1], [0], [0], [1], [0, 0, 1, 1], [], []>} : vector<1x16xf32>, vector<16x128xf32>, vector<1x128xf32> -> vector<1x128xf32>
      %15 = arith.mulf %12, %12 : vector<16x128xf32>
      %cst_15 = arith.constant dense<0.000000e+00> : vector<1x128xf32>
      %16 = tpu.matmul %13, %15, %cst_15 {dimension_numbers = #tpu.dot_dimension_numbers<[1], [0], [0], [1], [0, 0, 1, 1], [], []>} : vector<1x16xf32>, vector<16x128xf32>, vector<1x128xf32> -> vector<1x128xf32>
      %cst_16 = arith.constant 1.250000e-01 : f32
      %17 = vector.broadcast %cst_16 : f32 to vector<1x128xf32>
      %18 = arith.mulf %14, %17 : vector<1x128xf32>
      %cst_17 = arith.constant 1.250000e-01 : f32
      %19 = vector.broadcast %cst_17 : f32 to vector<1x128xf32>
      %20 = arith.mulf %16, %19 : vector<1x128xf32>
      %21 = arith.mulf %18, %18 : vector<1x128xf32>
      %22 = arith.subf %20, %21 : vector<1x128xf32>
      %cst_18 = arith.constant 0.000000e+00 : f32
      %23 = vector.broadcast %cst_18 : f32 to vector<1x128xf32>
      %24 = arith.maximumf %22, %23 : vector<1x128xf32>
      %c0_19 = arith.constant 0 : index
      %c0_20 = arith.constant 0 : index
      %25 = vector.load %arg4[%c0_19, %c0_20] : memref<1x128xf32, #tpu.memory_space<vmem>>, vector<1x128xf32>
      %cst_21 = arith.constant 9.99999974E-6 : f32
      %26 = vector.broadcast %cst_21 : f32 to vector<1x128xf32>
      %27 = arith.addf %24, %26 : vector<1x128xf32>
      %28 = math.rsqrt %27 : vector<1x128xf32>
      %29 = arith.mulf %25, %28 : vector<1x128xf32>
      %c0_22 = arith.constant 0 : index
      %c0_23 = arith.constant 0 : index
      %30 = vector.load %arg5[%c0_22, %c0_23] : memref<1x128xf32, #tpu.memory_space<vmem>>, vector<1x128xf32>
      %31 = arith.mulf %18, %29 : vector<1x128xf32>
      %32 = arith.subf %30, %31 : vector<1x128xf32>
      %33 = vector.broadcast %29 : vector<1x128xf32> to vector<16x128xf32>
      %34 = arith.mulf %12, %33 : vector<16x128xf32>
      %35 = vector.broadcast %32 : vector<1x128xf32> to vector<16x128xf32>
      %36 = arith.addf %34, %35 : vector<16x128xf32>
      %cst_24 = arith.constant 0.000000e+00 : f32
      %37 = vector.broadcast %cst_24 : f32 to vector<16x128xf32>
      %38 = arith.maximumf %36, %37 : vector<16x128xf32>
      %39 = arith.truncf %38 : vector<16x128xf32> to vector<16x128xbf16>
      %c0_25 = arith.constant 0 : index
      %c0_26 = arith.constant 0 : index
      %40 = vector.load %arg9[%c0_25, %c0_26] : memref<16x128xbf16, #tpu.memory_space<vmem>>, vector<16x128xbf16>
      tpu.vector_store %arg9[%c0_25, %c0_26], %39 {strides = array<i32>} : memref<16x128xbf16, #tpu.memory_space<vmem>>, vector<16x128xbf16>,
    } else {
    }
    %c0 = arith.constant 0 : index
    %c0_1 = arith.constant 0 : index
    %3 = vector.load %arg9[%c0, %c0_1] : memref<16x128xbf16, #tpu.memory_space<vmem>>, vector<16x128xbf16>
    %c0_2 = arith.constant 0 : index
    %c0_3 = arith.constant 0 : index
    %4 = vector.load %arg6[%c0_2, %c0_3] : memref<128x512xbf16, #tpu.memory_space<vmem>>, vector<128x512xbf16>
    %cst = arith.constant dense<0.000000e+00> : vector<16x512xf32>
    %5 = tpu.matmul %3, %4, %cst {dimension_numbers = #tpu.dot_dimension_numbers<[1], [0], [0], [1], [0, 0, 1, 1], [], []>} : vector<16x128xbf16>, vector<128x512xbf16>, vector<16x512xf32> -> vector<16x512xf32>
    %c0_4 = arith.constant 0 : index
    %c0_5 = arith.constant 0 : index
    %6 = vector.load %arg7[%c0_4, %c0_5] : memref<1x512xf32, #tpu.memory_space<vmem>>, vector<1x512xf32>
    %7 = vector.broadcast %6 : vector<1x512xf32> to vector<16x512xf32>
    %8 = arith.addf %5, %7 : vector<16x512xf32>
    %c0_6 = arith.constant 0 : index
    %c0_7 = arith.constant 0 : index
    %9 = vector.load %arg8[%c0_6, %c0_7] : memref<16x512xf32, #tpu.memory_space<vmem>>, vector<16x512xf32>
    tpu.vector_store %arg8[%c0_6, %c0_7], %8 {strides = array<i32>} : memref<16x512xf32, #tpu.memory_space<vmem>>, vector<16x512xf32>,
    return
  }
  func.func @transform_0(%arg0: i32, %arg1: i32) -> (i32, i32) {
    %c0_i32 = arith.constant 0 : i32
    %c0_i32_0 = arith.constant 0 : i32
    %c0_i32_1 = arith.constant 0 : i32
    return %c0_i32, %c0_i32_0 : i32, i32
  }
  func.func @transform_1(%arg0: i32, %arg1: i32) -> (i32, i32) {
    %c0_i32 = arith.constant 0 : i32
    %c0_i32_0 = arith.constant 0 : i32
    %c0_i32_1 = arith.constant 0 : i32
    return %c0_i32, %c0_i32_0 : i32, i32
  }
  func.func @transform_2(%arg0: i32, %arg1: i32) -> (i32, i32) {
    %c0_i32 = arith.constant 0 : i32
    %c0_i32_0 = arith.constant 0 : i32
    %c0_i32_1 = arith.constant 0 : i32
    return %c0_i32, %c0_i32_0 : i32, i32
  }
  func.func @transform_3(%arg0: i32, %arg1: i32) -> (i32, i32) {
    %c0_i32 = arith.constant 0 : i32
    %c0_i32_0 = arith.constant 0 : i32
    %c0_i32_1 = arith.constant 0 : i32
    return %c0_i32, %c0_i32_0 : i32, i32
  }
  func.func @transform_4(%arg0: i32, %arg1: i32) -> (i32, i32) {
    %c1_i32 = arith.constant 1 : i32
    %0 = arith.muli %arg0, %c1_i32 : i32
    %1 = arith.addi %0, %arg1 : i32
    %c0_i32 = arith.constant 0 : i32
    %c0_i32_0 = arith.constant 0 : i32
    return %c0_i32, %1 : i32, i32
  }
  func.func @transform_5(%arg0: i32, %arg1: i32) -> (i32, i32) {
    %c1_i32 = arith.constant 1 : i32
    %0 = arith.muli %arg0, %c1_i32 : i32
    %1 = arith.addi %0, %arg1 : i32
    %c0_i32 = arith.constant 0 : i32
    %c0_i32_0 = arith.constant 0 : i32
    return %c0_i32, %1 : i32, i32
  }
  func.func @transform_6(%arg0: i32, %arg1: i32) -> (i32, i32) {
    %c1_i32 = arith.constant 1 : i32
    %0 = arith.muli %arg0, %c1_i32 : i32
    %1 = arith.addi %0, %arg1 : i32
    %c0_i32 = arith.constant 0 : i32
    %c0_i32_0 = arith.constant 0 : i32
    return %c0_i32, %1 : i32, i32
  }
}

module attributes {stable_mosaic.version = 11 : i64} {
  func.func @kernel(%arg0: i32, %arg1: i32, %arg2: memref<16x128xbf16, #tpu.memory_space<vmem>>, %arg3: memref<128x128xbf16, #tpu.memory_space<vmem>>, %arg4: memref<1x128xf32, #tpu.memory_space<vmem>>, %arg5: memref<1x128xf32, #tpu.memory_space<vmem>>, %arg6: memref<128x512xbf16, #tpu.memory_space<vmem>>, %arg7: memref<1x512xf32, #tpu.memory_space<vmem>>, %arg8: memref<16x512xf32, #tpu.memory_space<vmem>>, %arg9: memref<16x128xbf16, #tpu.memory_space<vmem>>) attributes {dimension_semantics = [#tpu.dimension_semantics<parallel>, #tpu.dimension_semantics<arbitrary>], iteration_bounds = array<i64: 1, 1>, scalar_prefetch = 0 : i64, scratch_operands = 1 : i64, tpu.core_type = #tpu.core_type<tc>, window_params = [{pipeline_mode = #tpu.pipeline_mode<synchronous>, transform_indices = @transform_0, window_bounds = array<i64: 16, 128>}, {pipeline_mode = #tpu.pipeline_mode<synchronous>, transform_indices = @transform_1, window_bounds = array<i64: 128, 128>}, {pipeline_mode = #tpu.pipeline_mode<synchronous>, transform_indices = @transform_2, window_bounds = array<i64: 1, 128>}, {pipeline_mode = #tpu.pipeline_mode<synchronous>, transform_indices = @transform_3, window_bounds = array<i64: 1, 128>}, {transform_indices = @transform_4, window_bounds = array<i64: 128, 512>}, {transform_indices = @transform_5, window_bounds = array<i64: 1, 512>}, {transform_indices = @transform_6, window_bounds = array<i64: 16, 512>}]} {
    %c0_i32 = arith.constant 0 : i32
    %0 = arith.cmpi eq, %arg1, %c0_i32 : i32
    %1 = arith.extui %0 : i1 to i32
    %c0_i32_0 = arith.constant 0 : i32
    %2 = arith.cmpi ne, %1, %c0_i32_0 : i32
    scf.if %2 {
      %c0_8 = arith.constant 0 : index
      %c0_9 = arith.constant 0 : index
      %10 = vector.load %arg2[%c0_8, %c0_9] : memref<16x128xbf16, #tpu.memory_space<vmem>>, vector<16x128xbf16>
      %c0_10 = arith.constant 0 : index
      %c0_11 = arith.constant 0 : index
      %11 = vector.load %arg3[%c0_10, %c0_11] : memref<128x128xbf16, #tpu.memory_space<vmem>>, vector<128x128xbf16>
      %cst_12 = arith.constant dense<0.000000e+00> : vector<16x128xf32>
      %12 = tpu.matmul %10, %11, %cst_12 {dimension_numbers = #tpu.dot_dimension_numbers<[1], [0], [0], [1], [0, 0, 1, 1], [], []>} : vector<16x128xbf16>, vector<128x128xbf16>, vector<16x128xf32> -> vector<16x128xf32>
      %cst_13 = arith.constant 1.000000e+00 : f32
      %13 = vector.broadcast %cst_13 : f32 to vector<1x16xf32>
      %cst_14 = arith.constant dense<0.000000e+00> : vector<1x128xf32>
      %14 = tpu.matmul %13, %12, %cst_14 {dimension_numbers = #tpu.dot_dimension_numbers<[1], [0], [0], [1], [0, 0, 1, 1], [], []>} : vector<1x16xf32>, vector<16x128xf32>, vector<1x128xf32> -> vector<1x128xf32>
      %15 = arith.mulf %12, %12 : vector<16x128xf32>
      %cst_15 = arith.constant dense<0.000000e+00> : vector<1x128xf32>
      %16 = tpu.matmul %13, %15, %cst_15 {dimension_numbers = #tpu.dot_dimension_numbers<[1], [0], [0], [1], [0, 0, 1, 1], [], []>} : vector<1x16xf32>, vector<16x128xf32>, vector<1x128xf32> -> vector<1x128xf32>
      %cst_16 = arith.constant 1.250000e-01 : f32
      %17 = vector.broadcast %cst_16 : f32 to vector<1x128xf32>
      %18 = arith.mulf %14, %17 : vector<1x128xf32>
      %cst_17 = arith.constant 1.250000e-01 : f32
      %19 = vector.broadcast %cst_17 : f32 to vector<1x128xf32>
      %20 = arith.mulf %16, %19 : vector<1x128xf32>
      %21 = arith.mulf %18, %18 : vector<1x128xf32>
      %22 = arith.subf %20, %21 : vector<1x128xf32>
      %cst_18 = arith.constant 0.000000e+00 : f32
      %23 = vector.broadcast %cst_18 : f32 to vector<1x128xf32>
      %24 = arith.maximumf %22, %23 : vector<1x128xf32>
      %c0_19 = arith.constant 0 : index
      %c0_20 = arith.constant 0 : index
      %25 = vector.load %arg4[%c0_19, %c0_20] : memref<1x128xf32, #tpu.memory_space<vmem>>, vector<1x128xf32>
      %cst_21 = arith.constant 9.99999974E-6 : f32
      %26 = vector.broadcast %cst_21 : f32 to vector<1x128xf32>
      %27 = arith.addf %24, %26 : vector<1x128xf32>
      %28 = math.rsqrt %27 : vector<1x128xf32>
      %29 = arith.mulf %25, %28 : vector<1x128xf32>
      %c0_22 = arith.constant 0 : index
      %c0_23 = arith.constant 0 : index
      %30 = vector.load %arg5[%c0_22, %c0_23] : memref<1x128xf32, #tpu.memory_space<vmem>>, vector<1x128xf32>
      %31 = arith.mulf %18, %29 : vector<1x128xf32>
      %32 = arith.subf %30, %31 : vector<1x128xf32>
      %33 = vector.broadcast %29 : vector<1x128xf32> to vector<16x128xf32>
      %34 = arith.mulf %12, %33 : vector<16x128xf32>
      %35 = vector.broadcast %32 : vector<1x128xf32> to vector<16x128xf32>
      %36 = arith.addf %34, %35 : vector<16x128xf32>
      %cst_24 = arith.constant 0.000000e+00 : f32
      %37 = vector.broadcast %cst_24 : f32 to vector<16x128xf32>
      %38 = arith.maximumf %36, %37 : vector<16x128xf32>
      %39 = arith.truncf %38 : vector<16x128xf32> to vector<16x128xbf16>
      %c0_25 = arith.constant 0 : index
      %c0_26 = arith.constant 0 : index
      %40 = vector.load %arg9[%c0_25, %c0_26] : memref<16x128xbf16, #tpu.memory_space<vmem>>, vector<16x128xbf16>
      tpu.vector_store %arg9[%c0_25, %c0_26], %39 {strides = array<i32>} : memref<16x128xbf16, #tpu.memory_space<vmem>>, vector<16x128xbf16>,
    } else {
    }
    %c0 = arith.constant 0 : index
    %c0_1 = arith.constant 0 : index
    %3 = vector.load %arg9[%c0, %c0_1] : memref<16x128xbf16, #tpu.memory_space<vmem>>, vector<16x128xbf16>
    %c0_2 = arith.constant 0 : index
    %c0_3 = arith.constant 0 : index
    %4 = vector.load %arg6[%c0_2, %c0_3] : memref<128x512xbf16, #tpu.memory_space<vmem>>, vector<128x512xbf16>
    %cst = arith.constant dense<0.000000e+00> : vector<16x512xf32>
    %5 = tpu.matmul %3, %4, %cst {dimension_numbers = #tpu.dot_dimension_numbers<[1], [0], [0], [1], [0, 0, 1, 1], [], []>} : vector<16x128xbf16>, vector<128x512xbf16>, vector<16x512xf32> -> vector<16x512xf32>
    %c0_4 = arith.constant 0 : index
    %c0_5 = arith.constant 0 : index
    %6 = vector.load %arg7[%c0_4, %c0_5] : memref<1x512xf32, #tpu.memory_space<vmem>>, vector<1x512xf32>
    %7 = vector.broadcast %6 : vector<1x512xf32> to vector<16x512xf32>
    %8 = arith.addf %5, %7 : vector<16x512xf32>
    %c0_6 = arith.constant 0 : index
    %c0_7 = arith.constant 0 : index
    %9 = vector.load %arg8[%c0_6, %c0_7] : memref<16x512xf32, #tpu.memory_space<vmem>>, vector<16x512xf32>
    tpu.vector_store %arg8[%c0_6, %c0_7], %8 {strides = array<i32>} : memref<16x512xf32, #tpu.memory_space<vmem>>, vector<16x512xf32>,
    return
  }
  func.func @transform_0(%arg0: i32, %arg1: i32) -> (i32, i32) {
    %c0_i32 = arith.constant 0 : i32
    %c0_i32_0 = arith.constant 0 : i32
    %c0_i32_1 = arith.constant 0 : i32
    return %c0_i32, %c0_i32_0 : i32, i32
  }
  func.func @transform_1(%arg0: i32, %arg1: i32) -> (i32, i32) {
    %c0_i32 = arith.constant 0 : i32
    %c0_i32_0 = arith.constant 0 : i32
    %c0_i32_1 = arith.constant 0 : i32
    return %c0_i32, %c0_i32_0 : i32, i32
  }
  func.func @transform_2(%arg0: i32, %arg1: i32) -> (i32, i32) {
    %c0_i32 = arith.constant 0 : i32
    %c0_i32_0 = arith.constant 0 : i32
    %c0_i32_1 = arith.constant 0 : i32
    return %c0_i32, %c0_i32_0 : i32, i32
  }
  func.func @transform_3(%arg0: i32, %arg1: i32) -> (i32, i32) {
    %c0_i32 = arith.constant 0 : i32
    %c0_i32_0 = arith.constant 0 : i32
    %c0_i32_1 = arith.constant 0 : i32
    return %c0_i32, %c0_i32_0 : i32, i32
  }
  func.func @transform_4(%arg0: i32, %arg1: i32) -> (i32, i32) {
    %c1_i32 = arith.constant 1 : i32
    %0 = arith.muli %arg0, %c1_i32 : i32
    %1 = arith.addi %0, %arg1 : i32
    %c0_i32 = arith.constant 0 : i32
    %c0_i32_0 = arith.constant 0 : i32
    return %c0_i32, %1 : i32, i32
  }
  func.func @transform_5(%arg0: i32, %arg1: i32) -> (i32, i32) {
    %c1_i32 = arith.constant 1 : i32
    %0 = arith.muli %arg0, %c1_i32 : i32
    %1 = arith.addi %0, %arg1 : i32
    %c0_i32 = arith.constant 0 : i32
    %c0_i32_0 = arith.constant 0 : i32
    return %c0_i32, %1 : i32, i32
  }
  func.func @transform_6(%arg0: i32, %arg1: i32) -> (i32, i32) {
    %c1_i32 = arith.constant 1 : i32
    %0 = arith.muli %arg0, %c1_i32 : i32
    %1 = arith.addi %0, %arg1 : i32
    %c0_i32 = arith.constant 0 : i32
    %c0_i32_0 = arith.constant 0 : i32
    return %c0_i32, %1 : i32, i32
  }
}

</mosaic_0001>

<bundles_post_ra>
// kernel: tpu_custom_call.1
= control target key start
LH: loop header
LB: loop body
LE: loop exit
PB: predicated region body
PF: predicated region fallthrough
CT: control target
= control target key end

     0   :  { %11 = vsyncpa [#allocation4], 0  ;;  %s1084_s0 = inlined_call_operand.hbm [shape: bf16[16,128], index: 0, kind: input, shape index: {}]   ;;  %s1085_s1 = inlined_call_operand.hbm [shape: bf16[128,128], index: 1, kind: input, shape index: {}]   ;;  %s1086_s2 = inlined_call_operand.vmem [shape: f32[1,128], index: 2, kind: input, shape index: {}]   ;;  %s1087_s3 = inlined_call_operand.vmem [shape: f32[1,128], index: 3, kind: input, shape index: {}]   ;;  %s1088_s4 = inlined_call_operand.hbm [shape: bf16[128,512], index: 4, kind: input, shape index: {}]   ;;  %s1089_s5 = inlined_call_operand.vmem [shape: f32[1,512], index: 5, kind: input, shape index: {}]   ;;  %s1090_s6 = inlined_call_operand.hbm [shape: f32[16,512], index: 6, kind: output, shape index: {}]  }
   0x1   :  { %12 = vsyncpa [#allocation7], 0 }
   0x2   :  { %13 = vsyncpa [#allocation5], 0  ;;  %s999_s21 = smov [#allocation6]   ;;  %s1000_s23 = smov [#allocation3]  }
   0x3   :  { %s31_s22 = sshll.u32 %s999_s21, 4  ;;  %s19_s24 = sshll.u32 %s1000_s23, 4  ;;  %s32_s22 = int_to_ptr.vmem [resolvable:$true] %s31_s22  ;;  %s20_s24 = int_to_ptr.vmem [resolvable:$true] %s19_s24 }
   0x4   :  { %s921_s25 = scalar_lea.vmem %s32_s22, 1024  ;;  %p926_p1 = scmp.lt.s32.totalorder %s32_s22, %s32_s22 }
   0x5   :  { %p922_p0 = scmp.ne.s32.totalorder %s32_s22, %s921_s25  ;;  %p927_p2 = scmp.lt.s32.totalorder %s921_s25, %s921_s25 }
   0x7   :  { %p928_p3 = por %p927_p2, %p926_p1 }
   0x9   :  { %p929_p4 = pnand %p928_p3, %p922_p0 }
   0xb   :  { %932 = shalt.err (!%p929_p4)
}
   0xc   :  { %s1001_s26 = smov 64   ;;  %s1002_s27 = smov 4  }
   0xd   :  { %37 = dma.hbm_to_vmem [thread:$0]  %s1085_s1, 1024, %s32_s22, [#allocation7], %s1001_s26, %s1001_s26, %s1002_s27  }
   0xe   :  { %s941_s30 = scalar_lea.vmem %s20_s24, 128  ;;  %p946_p6 = scmp.lt.s32.totalorder %s20_s24, %s20_s24 }
   0xf   :  { %p942_p5 = scmp.ne.s32.totalorder %s20_s24, %s941_s30  ;;  %p947_p7 = scmp.lt.s32.totalorder %s941_s30, %s941_s30 }
  0x11   :  { %p948_p8 = por %p947_p7, %p946_p6 }
  0x13   :  { %p949_p9 = pnand %p948_p8, %p942_p5 }
  0x15   :  { %952 = shalt.err (!%p949_p9)
}
  0x16   :  { %25 = dma.hbm_to_vmem [thread:$0]  %s1084_s0, 128, %s20_s24, [#allocation4], %s1001_s26, %s1001_s26, %s1002_s27  }
  0x17   :  { %s1003_s9 = smov [#allocation8]  }
  0x18   :  { %s51_s10 = sshll.u32 %s1003_s9, 4  ;;  %s52_s10 = int_to_ptr.vmem [resolvable:$true] %s51_s10 }
  0x19   :  { %s961_s11 = scalar_lea.vmem %s52_s10, 4096  ;;  %p966_p11 = scmp.lt.s32.totalorder %s52_s10, %s52_s10 }
  0x1a   :  { %p962_p10 = scmp.ne.s32.totalorder %s52_s10, %s961_s11  ;;  %p967_p12 = scmp.lt.s32.totalorder %s961_s11, %s961_s11 }
  0x1c   :  { %p968_p13 = por %p967_p12, %p966_p11 }
  0x1e   :  { %p969_p0 = pnand %p968_p13, %p962_p10 }
  0x20   :  { %972 = shalt.err (!%p969_p0)
}
  0x21   :  { %s1004_s1 = smov 256   ;;  %s1005_s12 = smov 16  }
  0x22   :  { %57 = dma.hbm_to_vmem [thread:$0]  %s1088_s4, 4096, %s52_s10, [#allocation7], %s1004_s1, %s1004_s1, %s1005_s12  }
  0x23   :  { %993 = dma.done.wait [#allocation4], 128  }
  0x24   :  { %994 = vsyncadd [#allocation4], 4294967168 }
  0x25   :  { %995 = dma.done.wait [#allocation7], 5120  }
  0x26   :  { %996 = vsyncadd [#allocation7], 4294962176  ;;  %v1006_v0 = vmov 0.0   ;;  %vm1007_vm0 = vmmov 0   ;;  %v853_v1 = vld [vmem:[#allocation6 + $0x38] sm:$0xff]   ;;  %v854_v2 = vld [vmem:[#allocation6 + $0x30] sm:$0xff]   ;;  %v369_v60 = vlaneseq }
  0x27   :  { %805 = vmatprep.subr.bf16.mxu0 %v1006_v0  ;;  %821 = vmatprep.mubr.msk.bf16.mxu0 %vm1007_vm0, %v1006_v0  ;;  %v855_v3 = vld [vmem:[#allocation6 + $0x28] sm:$0xff]   ;;  %v856_v4 = vld [vmem:[#allocation6 + $0x20] sm:$0xff]   ;;  %v857_v5 = vld [vmem:[#allocation6 + $0x18] sm:$0xff]   ;;  %vm210_vm1 = vcmask 130048   ;;  %v1008_v15 = vmov 1.0   ;;  %v1009_v49 = vmov 0  }
  0x28   :  { %825 = vmatprep.subr.mxu1 %v1006_v0  ;;  %829 = vmatprep.mubr.msk.f32.mxu1 %vm1007_vm0, %v1006_v0  ;;  %v858_v6 = vld [vmem:[#allocation6 + $0x10] sm:$0xff]   ;;  %v859_v7 = vld [vmem:[#allocation6 + $0x8] sm:$0xff]   ;;  %v860_v8 = vld [vmem:[#allocation6] sm:$0xff]   ;;  %v370_v61 = vshrl.u32 %v369_v60, 7  ;;  %s1010_s17 = smov [#allocation9]  }
  0x29   :  { %806 = vmatpush3.bf16.msra.mxu0 %v853_v1  ;;  %v861_v9 = vld [vmem:[#allocation3] sm:$0xff]   ;;  %v864_v17 = vld [vmem:[#allocation8 + $0xe4] ss:$16 sps:$4 sm:$0xff]   ;;  %v862_v19 = vld [vmem:[#allocation8 + $0xe0] ss:$16 sps:$4 sm:$0xff]   ;;  %s721_s18 = sshll.u32 %s1010_s17, 4  ;;  %s722_s18 = int_to_ptr.vmem [resolvable:$true] %s721_s18 }
  0x2a   :  { %807 = vmatprep.subr.bf16.mxu0 %v1006_v0  ;;  %v867_v18 = vld [vmem:[#allocation8 + $0xec] ss:$16 sps:$4 sm:$0xff]   ;;  %v865_v20 = vld [vmem:[#allocation8 + $0xe8] ss:$16 sps:$4 sm:$0xff]   ;;  %v870_v21 = vld [vmem:[#allocation8 + $0xc4] ss:$16 sps:$4 sm:$0xff]   ;;  %p978_p2 = scmp.lt.s32.totalorder %s722_s18, %s722_s18 }
  0x2b   :  { %v873_v22 = vld [vmem:[#allocation8 + $0xcc] ss:$16 sps:$4 sm:$0xff]   ;;  %v868_v23 = vld [vmem:[#allocation8 + $0xc0] ss:$16 sps:$4 sm:$0xff]   ;;  %v871_v24 = vld [vmem:[#allocation8 + $0xc8] ss:$16 sps:$4 sm:$0xff]  }
  0x2c   :  { %v876_v25 = vld [vmem:[#allocation8 + $0xa4] ss:$16 sps:$4 sm:$0xff]   ;;  %v879_v26 = vld [vmem:[#allocation8 + $0xac] ss:$16 sps:$4 sm:$0xff]   ;;  %v874_v27 = vld [vmem:[#allocation8 + $0xa0] ss:$16 sps:$4 sm:$0xff]  }
  0x2d   :  { %808 = vmatpush3.bf16.msra.mxu0 %v854_v2  ;;  %v877_v28 = vld [vmem:[#allocation8 + $0xa8] ss:$16 sps:$4 sm:$0xff]   ;;  %v882_v29 = vld [vmem:[#allocation8 + $0x84] ss:$16 sps:$4 sm:$0xff]   ;;  %v885_v30 = vld [vmem:[#allocation8 + $0x8c] ss:$16 sps:$4 sm:$0xff]  }
  0x2e   :  { %809 = vmatprep.subr.bf16.mxu0 %v1006_v0  ;;  %v880_v31 = vld [vmem:[#allocation8 + $0x80] ss:$16 sps:$4 sm:$0xff]   ;;  %v883_v32 = vld [vmem:[#allocation8 + $0x88] ss:$16 sps:$4 sm:$0xff]   ;;  %v888_v33 = vld [vmem:[#allocation8 + $0x64] ss:$16 sps:$4 sm:$0xff]  }
  0x2f   :  { %v891_v34 = vld [vmem:[#allocation8 + $0x6c] ss:$16 sps:$4 sm:$0xff]   ;;  %v886_v35 = vld [vmem:[#allocation8 + $0x60] ss:$16 sps:$4 sm:$0xff]   ;;  %v889_v36 = vld [vmem:[#allocation8 + $0x68] ss:$16 sps:$4 sm:$0xff]  }
  0x30   :  { %v894_v37 = vld [vmem:[#allocation8 + $0x44] ss:$16 sps:$4 sm:$0xff]   ;;  %v897_v38 = vld [vmem:[#allocation8 + $0x4c] ss:$16 sps:$4 sm:$0xff]   ;;  %v892_v39 = vld [vmem:[#allocation8 + $0x40] ss:$16 sps:$4 sm:$0xff]  }
  0x31   :  { %810 = vmatpush3.bf16.msra.mxu0 %v855_v3  ;;  %v895_v40 = vld [vmem:[#allocation8 + $0x48] ss:$16 sps:$4 sm:$0xff]   ;;  %v900_v41 = vld [vmem:[#allocation8 + $0x24] ss:$16 sps:$4 sm:$0xff]   ;;  %v903_v42 = vld [vmem:[#allocation8 + $0x2c] ss:$16 sps:$4 sm:$0xff]  }
  0x32   :  { %811 = vmatprep.subr.bf16.mxu0 %v1006_v0  ;;  %v898_v43 = vld [vmem:[#allocation8 + $0x20] ss:$16 sps:$4 sm:$0xff]   ;;  %v901_v44 = vld [vmem:[#allocation8 + $0x28] ss:$16 sps:$4 sm:$0xff]   ;;  %v906_v45 = vld [vmem:[#allocation8 + $0x4] ss:$16 sps:$4 sm:$0xff]  }
  0x33   :  { %v909_v46 = vld [vmem:[#allocation8 + $0xc] ss:$16 sps:$4 sm:$0xff]   ;;  %v904_v47 = vld [vmem:[#allocation8] ss:$16 sps:$4 sm:$0xff]   ;;  %v907_v48 = vld [vmem:[#allocation8 + $0x8] ss:$16 sps:$4 sm:$0xff]  }
  0x34   :  { %v361_v62 = vld [vmem:[%s1086_s2] sm:$0x1]  ;;  %v371_v63 = vsub.s32 0, %v370_v61 }
  0x35   :  { %812 = vmatpush3.bf16.msra.mxu0 %v856_v4  ;;  %v365_v2 = vld [vmem:[%s1087_s3] sm:$0x1] }
  0x36   :  { %813 = vmatprep.subr.bf16.mxu0 %v1006_v0 }
  0x39   :  { %814 = vmatpush3.bf16.msra.mxu0 %v857_v5 }
  0x3a   :  { %815 = vmatprep.subr.bf16.mxu0 %v1006_v0 }
  0x3d   :  { %816 = vmatpush3.bf16.msra.mxu0 %v858_v6 }
  0x3e   :  { %817 = vmatprep.subr.bf16.mxu0 %v1006_v0 }
  0x41   :  { %818 = vmatpush3.bf16.msra.mxu0 %v859_v7 }
  0x42   :  { %819 = vmatprep.subr.bf16.mxu0 %v1006_v0 }
  0x45   :  { %820 = vmatpush3.bf16.msra.mxu0 %v860_v8 }
  0x46   :  { %661 = vmatprep.subr.bf16.mxu0 %v867_v18  ;;  %v430_v18 = vld [vmem:[%s1089_s5] sm:$0xf]  ;;  %s973_s5 = scalar_lea.vmem %s722_s18, 1024 }
  0x47   :  { %p974_p1 = scmp.ne.s32.totalorder %s722_s18, %s973_s5  ;;  %p979_p3 = scmp.lt.s32.totalorder %s973_s5, %s973_s5 }
  0x48   :  { %822 = vmatmul.mubr.bf16.vlgmr.msra.gmra.mxu0 %v861_v9 }
  0x49   :  { %662 = vmatpush1.bf16.msra.mxu0 %v865_v20  ;;  %693 = vmatprep.mubr.bf16.mxu0 %v1009_v49  ;;  %v446_v20 = vsub.s32 3, %v370_v61  ;;  %p980_p4 = por %p979_p3, %p978_p2 }
  0x4a   :  { %663 = vmatprep.subr.bf16.mxu0 %v873_v22 }
  0x4b   :  { %v447_v22 = vrot.slane %v430_v18, %v446_v20  ;;  %p981_p5 = pnand %p980_p4, %p974_p1 }
  0x4d   :  { %664 = vmatpush1.bf16.msra.mxu0 %v871_v24 }
  0x4e   :  { %665 = vmatprep.subr.bf16.mxu0 %v879_v26 }
  0x51   :  { %666 = vmatpush1.bf16.msra.mxu0 %v877_v28 }
  0x52   :  { %667 = vmatprep.subr.bf16.mxu0 %v885_v30 }
  0x55   :  { %668 = vmatpush1.bf16.msra.mxu0 %v883_v32 }
  0x56   :  { %669 = vmatprep.subr.bf16.mxu0 %v891_v34 }
  0x59   :  { %670 = vmatpush1.bf16.msra.mxu0 %v889_v36 }
  0x5a   :  { %671 = vmatprep.subr.bf16.mxu0 %v897_v38 }
  0x5d   :  { %672 = vmatpush1.bf16.msra.mxu0 %v895_v40 }
  0x5e   :  { %673 = vmatprep.subr.bf16.mxu0 %v903_v42 }
  0x61   :  { %674 = vmatpush1.bf16.msra.mxu0 %v901_v44 }
  0x62   :  { %675 = vmatprep.subr.bf16.mxu0 %v909_v46 }
  0x65   :  { %676 = vmatpush1.bf16.msra.mxu0 %v907_v48 }
 0x108   :  { %v1059_v10 = vpop.f32.mrf.mxu0 }
 0x109   :  { %v284_v16 = vmul.f32 %v1059_v10, %v1059_v10 }
 0x10a   :  { %v823_v11 = vpop.f32.mrf.mxu0 }
 0x10c   :  { %v1061_v12 = vpop.f32.mrf.mxu0 }
 0x10d   :  { %826 = vmatpush3.msra.mxu1 %v1061_v12  ;;  %v285_v14 = vmul.f32 %v1061_v12, %v1061_v12 }
 0x10e   :  { %v824_v13 = vpop.f32.mrf.mxu0  ;;  %827 = vmatprep.subr.mxu1 %v1006_v0 }
 0x10f   :  { %828 = vmatpush3.msra.mxu1 %v1059_v10 }
 0x110   :  { %830 = vmatmul.mubr.msk.f32.vlgmr.msra.gmra.mxu1 %vm210_vm1, %v1008_v15  ;;  %832 = vmatprep.subr.mxu1 %v1006_v0 }
 0x111   :  { %833 = vmatpush3.msra.mxu1 %v285_v14  ;;  %836 = vmatprep.mubr.msk.f32.mxu1 %vm1007_vm0, %v1006_v0 }
 0x112   :  { %834 = vmatprep.subr.mxu1 %v1006_v0 }
 0x113   :  { %835 = vmatpush3.msra.mxu1 %v284_v16 }
 0x114   :  { %837 = vmatmul.mubr.msk.f32.vlgmr.msra.gmra.mxu1 %vm210_vm1, %v1008_v15  ;;  %618 = vmatprep.subr.bf16.mxu1 %v864_v17  ;;  %v442_v17 = vsub.s32 2, %v370_v61 }
 0x115   :  { %619 = vmatpush1.bf16.msra.mxu1 %v862_v19  ;;  %650 = vmatprep.mubr.bf16.mxu1 %v1009_v49  ;;  %v438_v19 = vsub.s32 1, %v370_v61 }
 0x116   :  { %620 = vmatprep.subr.bf16.mxu1 %v870_v21  ;;  %v443_v21 = vrot.slane %v430_v18, %v442_v17 }
 0x119   :  { %621 = vmatpush1.bf16.msra.mxu1 %v868_v23 }
 0x11a   :  { %622 = vmatprep.subr.bf16.mxu1 %v876_v25 }
 0x11d   :  { %623 = vmatpush1.bf16.msra.mxu1 %v874_v27 }
 0x11e   :  { %624 = vmatprep.subr.bf16.mxu1 %v882_v29 }
 0x121   :  { %625 = vmatpush1.bf16.msra.mxu1 %v880_v31 }
 0x122   :  { %626 = vmatprep.subr.bf16.mxu1 %v888_v33 }
 0x125   :  { %627 = vmatpush1.bf16.msra.mxu1 %v886_v35 }
 0x126   :  { %628 = vmatprep.subr.bf16.mxu1 %v894_v37 }
 0x129   :  { %629 = vmatpush1.bf16.msra.mxu1 %v892_v39 }
 0x12a   :  { %630 = vmatprep.subr.bf16.mxu1 %v900_v41 }
 0x12d   :  { %631 = vmatpush1.bf16.msra.mxu1 %v898_v43 }
 0x12e   :  { %632 = vmatprep.subr.bf16.mxu1 %v906_v45 }
 0x131   :  { %633 = vmatpush1.bf16.msra.mxu1 %v904_v47 }
 0x1d0   :  { %v280_v50 = vpop.f32.mrf.mxu1 }
 0x1d1   :  { %v356_v51 = vmul.f32 0.125, %v280_v50 }
 0x1d2   :  { %v831_v52 = vpop.f32.mrf.mxu1 }
 0x1d3   :  { %v358_v54 = vmul.f32 %v356_v51, %v356_v51 }
 0x1d4   :  { %v352_v53 = vpop.f32.mrf.mxu1 }
 0x1d5   :  { %v357_v55 = vmul.f32 0.125, %v352_v53 }
 0x1d6   :  { %v838_v56 = vpop.f32.mrf.mxu1 }
 0x1d7   :  { %v359_v57 = vsub.f32 %v357_v55, %v358_v54 }
 0x1d9   :  { %v360_v58 = vmax.f32 %v359_v57, 0.0 }
 0x1db   :  { %v362_v59 = vadd.f32 1e-05, %v360_v58 }
 0x1dd   :  { %911 = vrsqrt.f32 %v362_v59 }
 0x1ea   :  { %v912_v0 = vpop.eup %911 }
 0x1eb   :  { %v364_v1 = vmul.f32 %v912_v0, %v361_v62 }
 0x1ed   :  { %v366_v3 = vmul.f32 %v364_v1, %v356_v51  ;;  %v372_v4 = vrot.slane %v364_v1, %v371_v63 }
 0x1ef   :  { %v367_v5 = vsub.f32 %v365_v2, %v366_v3  ;;  %v374_v6 = vmul.f32 %v372_v4, %v1059_v10  ;;  %v375_v7 = vmul.f32 %v372_v4, %v1061_v12  ;;  %v435_v10 = vrot.slane %v430_v18, %v371_v63 }
 0x1f0   :  { %v439_v12 = vrot.slane %v430_v18, %v438_v19 }
 0x1f1   :  { %v380_v8 = vrot.slane %v367_v5, %v371_v63 }
 0x1f3   :  { %v382_v9 = vadd.f32 %v380_v8, %v374_v6  ;;  %v383_v11 = vadd.f32 %v380_v8, %v375_v7 }
 0x1f5   :  { %v384_v13 = vmax.f32 %v382_v9, 0.0  ;;  %v385_v14 = vmax.f32 %v383_v11, 0.0 }
 0x1f7   :  { %v788_v15 = vpack.c.bf16 %v385_v14, %v384_v13 }
 0x1f9   :  { %789 = vst [vmem:[#allocation2] sm:$0xff] %v788_v15  }
 0x200   :  { %v910_v16 = vld [vmem:[#allocation2] sm:$0xff]  }
 0x201   :  { %651 = vmatmul.mubr.bf16.vlgmr.msra.gmra.mxu1 %v910_v16  ;;  %694 = vmatmul.mubr.bf16.vlgmr.msra.gmra.mxu0 %v910_v16 }
 0x2c1   :  { %v652_v23 = vpop.f32.mrf.mxu1  ;;  %v695_v24 = vpop.f32.mrf.mxu0 }
 0x2c2   :  { %v653_v25 = vadd.f32 %v652_v23, %v435_v10  ;;  %v696_v26 = vadd.f32 %v695_v24, %v443_v21 }
 0x2c3   :  { %v654_v27 = vpop.f32.mrf.mxu1  ;;  %v697_v28 = vpop.f32.mrf.mxu0 }
 0x2c4   :  { %704 = vst [vmem:[#allocation9] sm:$0xff] %v653_v25  ;;  %706 = vst [vmem:[#allocation9 + $0x10] sm:$0xff] %v696_v26  ;;  %v655_v29 = vadd.f32 %v654_v27, %v439_v12  ;;  %v698_v30 = vadd.f32 %v697_v28, %v447_v22 }
 0x2c5   :  { %v656_v31 = vpop.f32.mrf.mxu1  ;;  %v699_v32 = vpop.f32.mrf.mxu0 }
 0x2c6   :  { %705 = vst [vmem:[#allocation9 + $0x8] sm:$0xff] %v655_v29  ;;  %707 = vst [vmem:[#allocation9 + $0x18] sm:$0xff] %v698_v30  ;;  %v657_v33 = vadd.f32 %v656_v31, %v435_v10  ;;  %v700_v34 = vadd.f32 %v699_v32, %v443_v21 }
 0x2c7   :  { %v658_v35 = vpop.f32.mrf.mxu1  ;;  %v701_v36 = vpop.f32.mrf.mxu0 }
 0x2c8   :  { %708 = vst [vmem:[#allocation9 + $0x20] sm:$0xff] %v657_v33  ;;  %710 = vst [vmem:[#allocation9 + $0x30] sm:$0xff] %v700_v34  ;;  %v659_v37 = vadd.f32 %v658_v35, %v439_v12  ;;  %v702_v38 = vadd.f32 %v701_v36, %v447_v22 }
 0x2ca   :  { %709 = vst [vmem:[#allocation9 + $0x28] sm:$0xff] %v659_v37  ;;  %711 = vst [vmem:[#allocation9 + $0x38] sm:$0xff] %v702_v38 }
 0x2cb   :  { %984 = shalt.err (!%p981_p5)
}
 0x2cc   :  { %s1011_s19 = smov 512   ;;  %s1012_s20 = smov 32  }
 0x2cd   :  { %727 = dma.vmem_to_hbm [thread:$0]  %s722_s18, 1024, %s1090_s6, [#allocation5], %s1011_s19, %s1011_s19, %s1012_s20  }
 0x2ce   :  { %997 = dma.done.wait [#allocation5], 1024  }
 0x2cf   :  { %998 = vsyncadd [#allocation5], 4294966272 }
 0x2d0   :  { %731 = vsyncpa [#allocation4], 1 }
 0x2d1   :  { %732 = vsyncpa [#allocation7], 1 }
 0x2d2   :  { %733 = vsyncpa [#allocation5], 1 }

// kernel: tpu_custom_call.1
= control target key start
LH: loop header
LB: loop body
LE: loop exit
PB: predicated region body
PF: predicated region fallthrough
CT: control target
= control target key end

     0   :  { %11 = vsyncpa [#allocation4], 0  ;;  %s1084_s0 = inlined_call_operand.hbm [shape: bf16[16,128], index: 0, kind: input, shape index: {}]   ;;  %s1085_s1 = inlined_call_operand.hbm [shape: bf16[128,128], index: 1, kind: input, shape index: {}]   ;;  %s1086_s2 = inlined_call_operand.vmem [shape: f32[1,128], index: 2, kind: input, shape index: {}]   ;;  %s1087_s3 = inlined_call_operand.vmem [shape: f32[1,128], index: 3, kind: input, shape index: {}]   ;;  %s1088_s4 = inlined_call_operand.hbm [shape: bf16[128,512], index: 4, kind: input, shape index: {}]   ;;  %s1089_s5 = inlined_call_operand.vmem [shape: f32[1,512], index: 5, kind: input, shape index: {}]   ;;  %s1090_s6 = inlined_call_operand.hbm [shape: f32[16,512], index: 6, kind: output, shape index: {}]  }
   0x1   :  { %12 = vsyncpa [#allocation7], 0 }
   0x2   :  { %13 = vsyncpa [#allocation5], 0  ;;  %s999_s21 = smov [#allocation6]   ;;  %s1000_s23 = smov [#allocation3]  }
   0x3   :  { %s31_s22 = sshll.u32 %s999_s21, 4  ;;  %s19_s24 = sshll.u32 %s1000_s23, 4  ;;  %s32_s22 = int_to_ptr.vmem [resolvable:$true] %s31_s22  ;;  %s20_s24 = int_to_ptr.vmem [resolvable:$true] %s19_s24 }
   0x4   :  { %s921_s25 = scalar_lea.vmem %s32_s22, 1024  ;;  %p926_p1 = scmp.lt.s32.totalorder %s32_s22, %s32_s22 }
   0x5   :  { %p922_p0 = scmp.ne.s32.totalorder %s32_s22, %s921_s25  ;;  %p927_p2 = scmp.lt.s32.totalorder %s921_s25, %s921_s25 }
   0x7   :  { %p928_p3 = por %p927_p2, %p926_p1 }
   0x9   :  { %p929_p4 = pnand %p928_p3, %p922_p0 }
   0xb   :  { %932 = shalt.err (!%p929_p4)
}
   0xc   :  { %s1001_s26 = smov 64   ;;  %s1002_s27 = smov 4  }
   0xd   :  { %37 = dma.hbm_to_vmem [thread:$0]  %s1085_s1, 1024, %s32_s22, [#allocation7], %s1001_s26, %s1001_s26, %s1002_s27  }
   0xe   :  { %s941_s30 = scalar_lea.vmem %s20_s24, 128  ;;  %p946_p6 = scmp.lt.s32.totalorder %s20_s24, %s20_s24 }
   0xf   :  { %p942_p5 = scmp.ne.s32.totalorder %s20_s24, %s941_s30  ;;  %p947_p7 = scmp.lt.s32.totalorder %s941_s30, %s941_s30 }
  0x11   :  { %p948_p8 = por %p947_p7, %p946_p6 }
  0x13   :  { %p949_p9 = pnand %p948_p8, %p942_p5 }
  0x15   :  { %952 = shalt.err (!%p949_p9)
}
  0x16   :  { %25 = dma.hbm_to_vmem [thread:$0]  %s1084_s0, 128, %s20_s24, [#allocation4], %s1001_s26, %s1001_s26, %s1002_s27  }
  0x17   :  { %s1003_s9 = smov [#allocation8]  }
  0x18   :  { %s51_s10 = sshll.u32 %s1003_s9, 4  ;;  %s52_s10 = int_to_ptr.vmem [resolvable:$true] %s51_s10 }
  0x19   :  { %s961_s11 = scalar_lea.vmem %s52_s10, 4096  ;;  %p966_p11 = scmp.lt.s32.totalorder %s52_s10, %s52_s10 }
  0x1a   :  { %p962_p10 = scmp.ne.s32.totalorder %s52_s10, %s961_s11  ;;  %p967_p12 = scmp.lt.s32.totalorder %s961_s11, %s961_s11 }
  0x1c   :  { %p968_p13 = por %p967_p12, %p966_p11 }
  0x1e   :  { %p969_p0 = pnand %p968_p13, %p962_p10 }
  0x20   :  { %972 = shalt.err (!%p969_p0)
}
  0x21   :  { %s1004_s1 = smov 256   ;;  %s1005_s12 = smov 16  }
  0x22   :  { %57 = dma.hbm_to_vmem [thread:$0]  %s1088_s4, 4096, %s52_s10, [#allocation7], %s1004_s1, %s1004_s1, %s1005_s12  }
  0x23   :  { %993 = dma.done.wait [#allocation4], 128  }
  0x24   :  { %994 = vsyncadd [#allocation4], 4294967168 }
  0x25   :  { %995 = dma.done.wait [#allocation7], 5120  }
  0x26   :  { %996 = vsyncadd [#allocation7], 4294962176  ;;  %v1006_v0 = vmov 0.0   ;;  %vm1007_vm0 = vmmov 0   ;;  %v853_v1 = vld [vmem:[#allocation6 + $0x38] sm:$0xff]   ;;  %v854_v2 = vld [vmem:[#allocation6 + $0x30] sm:$0xff]   ;;  %v369_v60 = vlaneseq }
  0x27   :  { %805 = vmatprep.subr.bf16.mxu0 %v1006_v0  ;;  %821 = vmatprep.mubr.msk.bf16.mxu0 %vm1007_vm0, %v1006_v0  ;;  %v855_v3 = vld [vmem:[#allocation6 + $0x28] sm:$0xff]   ;;  %v856_v4 = vld [vmem:[#allocation6 + $0x20] sm:$0xff]   ;;  %v857_v5 = vld [vmem:[#allocation6 + $0x18] sm:$0xff]   ;;  %vm210_vm1 = vcmask 130048   ;;  %v1008_v15 = vmov 1.0   ;;  %v1009_v49 = vmov 0  }
  0x28   :  { %825 = vmatprep.subr.mxu1 %v1006_v0  ;;  %829 = vmatprep.mubr.msk.f32.mxu1 %vm1007_vm0, %v1006_v0  ;;  %v858_v6 = vld [vmem:[#allocation6 + $0x10] sm:$0xff]   ;;  %v859_v7 = vld [vmem:[#allocation6 + $0x8] sm:$0xff]   ;;  %v860_v8 = vld [vmem:[#allocation6] sm:$0xff]   ;;  %v370_v61 = vshrl.u32 %v369_v60, 7  ;;  %s1010_s17 = smov [#allocation9]  }
  0x29   :  { %806 = vmatpush3.bf16.msra.mxu0 %v853_v1  ;;  %v861_v9 = vld [vmem:[#allocation3] sm:$0xff]   ;;  %v864_v17 = vld [vmem:[#allocation8 + $0xe4] ss:$16 sps:$4 sm:$0xff]   ;;  %v862_v19 = vld [vmem:[#allocation8 + $0xe0] ss:$16 sps:$4 sm:$0xff]   ;;  %s721_s18 = sshll.u32 %s1010_s17, 4  ;;  %s722_s18 = int_to_ptr.vmem [resolvable:$true] %s721_s18 }
  0x2a   :  { %807 = vmatprep.subr.bf16.mxu0 %v1006_v0  ;;  %v867_v18 = vld [vmem:[#allocation8 + $0xec] ss:$16 sps:$4 sm:$0xff]   ;;  %v865_v20 = vld [vmem:[#allocation8 + $0xe8] ss:$16 sps:$4 sm:$0xff]   ;;  %v870_v21 = vld [vmem:[#allocation8 + $0xc4] ss:$16 sps:$4 sm:$0xff]   ;;  %p978_p2 = scmp.lt.s32.totalorder %s722_s18, %s722_s18 }
  0x2b   :  { %v873_v22 = vld [vmem:[#allocation8 + $0xcc] ss:$16 sps:$4 sm:$0xff]   ;;  %v868_v23 = vld [vmem:[#allocation8 + $0xc0] ss:$16 sps:$4 sm:$0xff]   ;;  %v871_v24 = vld [vmem:[#allocation8 + $0xc8] ss:$16 sps:$4 sm:$0xff]  }
  0x2c   :  { %v876_v25 = vld [vmem:[#allocation8 + $0xa4] ss:$16 sps:$4 sm:$0xff]   ;;  %v879_v26 = vld [vmem:[#allocation8 + $0xac] ss:$16 sps:$4 sm:$0xff]   ;;  %v874_v27 = vld [vmem:[#allocation8 + $0xa0] ss:$16 sps:$4 sm:$0xff]  }
  0x2d   :  { %808 = vmatpush3.bf16.msra.mxu0 %v854_v2  ;;  %v877_v28 = vld [vmem:[#allocation8 + $0xa8] ss:$16 sps:$4 sm:$0xff]   ;;  %v882_v29 = vld [vmem:[#allocation8 + $0x84] ss:$16 sps:$4 sm:$0xff]   ;;  %v885_v30 = vld [vmem:[#allocation8 + $0x8c] ss:$16 sps:$4 sm:$0xff]  }
  0x2e   :  { %809 = vmatprep.subr.bf16.mxu0 %v1006_v0  ;;  %v880_v31 = vld [vmem:[#allocation8 + $0x80] ss:$16 sps:$4 sm:$0xff]   ;;  %v883_v32 = vld [vmem:[#allocation8 + $0x88] ss:$16 sps:$4 sm:$0xff]   ;;  %v888_v33 = vld [vmem:[#allocation8 + $0x64] ss:$16 sps:$4 sm:$0xff]  }
  0x2f   :  { %v891_v34 = vld [vmem:[#allocation8 + $0x6c] ss:$16 sps:$4 sm:$0xff]   ;;  %v886_v35 = vld [vmem:[#allocation8 + $0x60] ss:$16 sps:$4 sm:$0xff]   ;;  %v889_v36 = vld [vmem:[#allocation8 + $0x68] ss:$16 sps:$4 sm:$0xff]  }
  0x30   :  { %v894_v37 = vld [vmem:[#allocation8 + $0x44] ss:$16 sps:$4 sm:$0xff]   ;;  %v897_v38 = vld [vmem:[#allocation8 + $0x4c] ss:$16 sps:$4 sm:$0xff]   ;;  %v892_v39 = vld [vmem:[#allocation8 + $0x40] ss:$16 sps:$4 sm:$0xff]  }
  0x31   :  { %810 = vmatpush3.bf16.msra.mxu0 %v855_v3  ;;  %v895_v40 = vld [vmem:[#allocation8 + $0x48] ss:$16 sps:$4 sm:$0xff]   ;;  %v900_v41 = vld [vmem:[#allocation8 + $0x24] ss:$16 sps:$4 sm:$0xff]   ;;  %v903_v42 = vld [vmem:[#allocation8 + $0x2c] ss:$16 sps:$4 sm:$0xff]  }
  0x32   :  { %811 = vmatprep.subr.bf16.mxu0 %v1006_v0  ;;  %v898_v43 = vld [vmem:[#allocation8 + $0x20] ss:$16 sps:$4 sm:$0xff]   ;;  %v901_v44 = vld [vmem:[#allocation8 + $0x28] ss:$16 sps:$4 sm:$0xff]   ;;  %v906_v45 = vld [vmem:[#allocation8 + $0x4] ss:$16 sps:$4 sm:$0xff]  }
  0x33   :  { %v909_v46 = vld [vmem:[#allocation8 + $0xc] ss:$16 sps:$4 sm:$0xff]   ;;  %v904_v47 = vld [vmem:[#allocation8] ss:$16 sps:$4 sm:$0xff]   ;;  %v907_v48 = vld [vmem:[#allocation8 + $0x8] ss:$16 sps:$4 sm:$0xff]  }
  0x34   :  { %v361_v62 = vld [vmem:[%s1086_s2] sm:$0x1]  ;;  %v371_v63 = vsub.s32 0, %v370_v61 }
  0x35   :  { %812 = vmatpush3.bf16.msra.mxu0 %v856_v4  ;;  %v365_v2 = vld [vmem:[%s1087_s3] sm:$0x1] }
  0x36   :  { %813 = vmatprep.subr.bf16.mxu0 %v1006_v0 }
  0x39   :  { %814 = vmatpush3.bf16.msra.mxu0 %v857_v5 }
  0x3a   :  { %815 = vmatprep.subr.bf16.mxu0 %v1006_v0 }
  0x3d   :  { %816 = vmatpush3.bf16.msra.mxu0 %v858_v6 }
  0x3e   :  { %817 = vmatprep.subr.bf16.mxu0 %v1006_v0 }
  0x41   :  { %818 = vmatpush3.bf16.msra.mxu0 %v859_v7 }
  0x42   :  { %819 = vmatprep.subr.bf16.mxu0 %v1006_v0 }
  0x45   :  { %820 = vmatpush3.bf16.msra.mxu0 %v860_v8 }
  0x46   :  { %661 = vmatprep.subr.bf16.mxu0 %v867_v18  ;;  %v430_v18 = vld [vmem:[%s1089_s5] sm:$0xf]  ;;  %s973_s5 = scalar_lea.vmem %s722_s18, 1024 }
  0x47   :  { %p974_p1 = scmp.ne.s32.totalorder %s722_s18, %s973_s5  ;;  %p979_p3 = scmp.lt.s32.totalorder %s973_s5, %s973_s5 }
  0x48   :  { %822 = vmatmul.mubr.bf16.vlgmr.msra.gmra.mxu0 %v861_v9 }
  0x49   :  { %662 = vmatpush1.bf16.msra.mxu0 %v865_v20  ;;  %693 = vmatprep.mubr.bf16.mxu0 %v1009_v49  ;;  %v446_v20 = vsub.s32 3, %v370_v61  ;;  %p980_p4 = por %p979_p3, %p978_p2 }
  0x4a   :  { %663 = vmatprep.subr.bf16.mxu0 %v873_v22 }
  0x4b   :  { %v447_v22 = vrot.slane %v430_v18, %v446_v20  ;;  %p981_p5 = pnand %p980_p4, %p974_p1 }
  0x4d   :  { %664 = vmatpush1.bf16.msra.mxu0 %v871_v24 }
  0x4e   :  { %665 = vmatprep.subr.bf16.mxu0 %v879_v26 }
  0x51   :  { %666 = vmatpush1.bf16.msra.mxu0 %v877_v28 }
  0x52   :  { %667 = vmatprep.subr.bf16.mxu0 %v885_v30 }
  0x55   :  { %668 = vmatpush1.bf16.msra.mxu0 %v883_v32 }
  0x56   :  { %669 = vmatprep.subr.bf16.mxu0 %v891_v34 }
  0x59   :  { %670 = vmatpush1.bf16.msra.mxu0 %v889_v36 }
  0x5a   :  { %671 = vmatprep.subr.bf16.mxu0 %v897_v38 }
  0x5d   :  { %672 = vmatpush1.bf16.msra.mxu0 %v895_v40 }
  0x5e   :  { %673 = vmatprep.subr.bf16.mxu0 %v903_v42 }
  0x61   :  { %674 = vmatpush1.bf16.msra.mxu0 %v901_v44 }
  0x62   :  { %675 = vmatprep.subr.bf16.mxu0 %v909_v46 }
  0x65   :  { %676 = vmatpush1.bf16.msra.mxu0 %v907_v48 }
 0x108   :  { %v1059_v10 = vpop.f32.mrf.mxu0 }
 0x109   :  { %v284_v16 = vmul.f32 %v1059_v10, %v1059_v10 }
 0x10a   :  { %v823_v11 = vpop.f32.mrf.mxu0 }
 0x10c   :  { %v1061_v12 = vpop.f32.mrf.mxu0 }
 0x10d   :  { %826 = vmatpush3.msra.mxu1 %v1061_v12  ;;  %v285_v14 = vmul.f32 %v1061_v12, %v1061_v12 }
 0x10e   :  { %v824_v13 = vpop.f32.mrf.mxu0  ;;  %827 = vmatprep.subr.mxu1 %v1006_v0 }
 0x10f   :  { %828 = vmatpush3.msra.mxu1 %v1059_v10 }
 0x110   :  { %830 = vmatmul.mubr.msk.f32.vlgmr.msra.gmra.mxu1 %vm210_vm1, %v1008_v15  ;;  %832 = vmatprep.subr.mxu1 %v1006_v0 }
 0x111   :  { %833 = vmatpush3.msra.mxu1 %v285_v14  ;;  %836 = vmatprep.mubr.msk.f32.mxu1 %vm1007_vm0, %v1006_v0 }
 0x112   :  { %834 = vmatprep.subr.mxu1 %v1006_v0 }
 0x113   :  { %835 = vmatpush3.msra.mxu1 %v284_v16 }
 0x114   :  { %837 = vmatmul.mubr.msk.f32.vlgmr.msra.gmra.mxu1 %vm210_vm1, %v1008_v15  ;;  %618 = vmatprep.subr.bf16.mxu1 %v864_v17  ;;  %v442_v17 = vsub.s32 2, %v370_v61 }
 0x115   :  { %619 = vmatpush1.bf16.msra.mxu1 %v862_v19  ;;  %650 = vmatprep.mubr.bf16.mxu1 %v1009_v49  ;;  %v438_v19 = vsub.s32 1, %v370_v61 }
 0x116   :  { %620 = vmatprep.subr.bf16.mxu1 %v870_v21  ;;  %v443_v21 = vrot.slane %v430_v18, %v442_v17 }
 0x119   :  { %621 = vmatpush1.bf16.msra.mxu1 %v868_v23 }
 0x11a   :  { %622 = vmatprep.subr.bf16.mxu1 %v876_v25 }
 0x11d   :  { %623 = vmatpush1.bf16.msra.mxu1 %v874_v27 }
 0x11e   :  { %624 = vmatprep.subr.bf16.mxu1 %v882_v29 }
 0x121   :  { %625 = vmatpush1.bf16.msra.mxu1 %v880_v31 }
 0x122   :  { %626 = vmatprep.subr.bf16.mxu1 %v888_v33 }
 0x125   :  { %627 = vmatpush1.bf16.msra.mxu1 %v886_v35 }
 0x126   :  { %628 = vmatprep.subr.bf16.mxu1 %v894_v37 }
 0x129   :  { %629 = vmatpush1.bf16.msra.mxu1 %v892_v39 }
 0x12a   :  { %630 = vmatprep.subr.bf16.mxu1 %v900_v41 }
 0x12d   :  { %631 = vmatpush1.bf16.msra.mxu1 %v898_v43 }
 0x12e   :  { %632 = vmatprep.subr.bf16.mxu1 %v906_v45 }
 0x131   :  { %633 = vmatpush1.bf16.msra.mxu1 %v904_v47 }
 0x1d0   :  { %v280_v50 = vpop.f32.mrf.mxu1 }
 0x1d1   :  { %v356_v51 = vmul.f32 0.125, %v280_v50 }
 0x1d2   :  { %v831_v52 = vpop.f32.mrf.mxu1 }
 0x1d3   :  { %v358_v54 = vmul.f32 %v356_v51, %v356_v51 }
 0x1d4   :  { %v352_v53 = vpop.f32.mrf.mxu1 }
 0x1d5   :  { %v357_v55 = vmul.f32 0.125, %v352_v53 }
 0x1d6   :  { %v838_v56 = vpop.f32.mrf.mxu1 }
 0x1d7   :  { %v359_v57 = vsub.f32 %v357_v55, %v358_v54 }
 0x1d9   :  { %v360_v58 = vmax.f32 %v359_v57, 0.0 }
 0x1db   :  { %v362_v59 = vadd.f32 1e-05, %v360_v58 }
 0x1dd   :  { %911 = vrsqrt.f32 %v362_v59 }
 0x1ea   :  { %v912_v0 = vpop.eup %911 }
 0x1eb   :  { %v364_v1 = vmul.f32 %v912_v0, %v361_v62 }
 0x1ed   :  { %v366_v3 = vmul.f32 %v364_v1, %v356_v51  ;;  %v372_v4 = vrot.slane %v364_v1, %v371_v63 }
 0x1ef   :  { %v367_v5 = vsub.f32 %v365_v2, %v366_v3  ;;  %v374_v6 = vmul.f32 %v372_v4, %v1059_v10  ;;  %v375_v7 = vmul.f32 %v372_v4, %v1061_v12  ;;  %v435_v10 = vrot.slane %v430_v18, %v371_v63 }
 0x1f0   :  { %v439_v12 = vrot.slane %v430_v18, %v438_v19 }
 0x1f1   :  { %v380_v8 = vrot.slane %v367_v5, %v371_v63 }
 0x1f3   :  { %v382_v9 = vadd.f32 %v380_v8, %v374_v6  ;;  %v383_v11 = vadd.f32 %v380_v8, %v375_v7 }
 0x1f5   :  { %v384_v13 = vmax.f32 %v382_v9, 0.0  ;;  %v385_v14 = vmax.f32 %v383_v11, 0.0 }
 0x1f7   :  { %v788_v15 = vpack.c.bf16 %v385_v14, %v384_v13 }
 0x1f9   :  { %789 = vst [vmem:[#allocation2] sm:$0xff] %v788_v15  }
 0x200   :  { %v910_v16 = vld [vmem:[#allocation2] sm:$0xff]  }
 0x201   :  { %651 = vmatmul.mubr.bf16.vlgmr.msra.gmra.mxu1 %v910_v16  ;;  %694 = vmatmul.mubr.bf16.vlgmr.msra.gmra.mxu0 %v910_v16 }
 0x2c1   :  { %v652_v23 = vpop.f32.mrf.mxu1  ;;  %v695_v24 = vpop.f32.mrf.mxu0 }
 0x2c2   :  { %v653_v25 = vadd.f32 %v652_v23, %v435_v10  ;;  %v696_v26 = vadd.f32 %v695_v24, %v443_v21 }
 0x2c3   :  { %v654_v27 = vpop.f32.mrf.mxu1  ;;  %v697_v28 = vpop.f32.mrf.mxu0 }
 0x2c4   :  { %704 = vst [vmem:[#allocation9] sm:$0xff] %v653_v25  ;;  %706 = vst [vmem:[#allocation9 + $0x10] sm:$0xff] %v696_v26  ;;  %v655_v29 = vadd.f32 %v654_v27, %v439_v12  ;;  %v698_v30 = vadd.f32 %v697_v28, %v447_v22 }
 0x2c5   :  { %v656_v31 = vpop.f32.mrf.mxu1  ;;  %v699_v32 = vpop.f32.mrf.mxu0 }
 0x2c6   :  { %705 = vst [vmem:[#allocation9 + $0x8] sm:$0xff] %v655_v29  ;;  %707 = vst [vmem:[#allocation9 + $0x18] sm:$0xff] %v698_v30  ;;  %v657_v33 = vadd.f32 %v656_v31, %v435_v10  ;;  %v700_v34 = vadd.f32 %v699_v32, %v443_v21 }
 0x2c7   :  { %v658_v35 = vpop.f32.mrf.mxu1  ;;  %v701_v36 = vpop.f32.mrf.mxu0 }
 0x2c8   :  { %708 = vst [vmem:[#allocation9 + $0x20] sm:$0xff] %v657_v33  ;;  %710 = vst [vmem:[#allocation9 + $0x30] sm:$0xff] %v700_v34  ;;  %v659_v37 = vadd.f32 %v658_v35, %v439_v12  ;;  %v702_v38 = vadd.f32 %v701_v36, %v447_v22 }
 0x2ca   :  { %709 = vst [vmem:[#allocation9 + $0x28] sm:$0xff] %v659_v37  ;;  %711 = vst [vmem:[#allocation9 + $0x38] sm:$0xff] %v702_v38 }
 0x2cb   :  { %984 = shalt.err (!%p981_p5)
}
 0x2cc   :  { %s1011_s19 = smov 512   ;;  %s1012_s20 = smov 32  }
 0x2cd   :  { %727 = dma.vmem_to_hbm [thread:$0]  %s722_s18, 1024, %s1090_s6, [#allocation5], %s1011_s19, %s1011_s19, %s1012_s20  }
 0x2ce   :  { %997 = dma.done.wait [#allocation5], 1024  }
 0x2cf   :  { %998 = vsyncadd [#allocation5], 4294966272 }
 0x2d0   :  { %731 = vsyncpa [#allocation4], 1 }
 0x2d1   :  { %732 = vsyncpa [#allocation7], 1 }
 0x2d2   :  { %733 = vsyncpa [#allocation5], 1 }

</bundles_post_ra>
